<compile_context>
chip_gen: v7x
topology: tpu7x:2x2x1
jax: 0.10.0
libtpu: 0.0.40
codegen_flags: <defaults>
</compile_context>

<pallas_src>
import functools

import jax
import jax.numpy as jnp
from jax import lax
from jax.experimental import pallas as pl
from jax.experimental.pallas import tpu as pltpu


_TARGET_TILE_BYTES = 3 * 1024 * 1024   # per-tile x footprint (~2-4 MiB sweet spot)


def _sublane(itemsize):
    # Sub-32-bit dtypes pack along sublanes: keep row tiles a multiple of the
    # packed sublane count (8 for f32, 16 for bf16, 32 for int8/fp8).
    return {4: 8, 2: 16, 1: 32}.get(int(itemsize), 8)


def _vmem_limit_bytes():
    """Per-generation scoped-VMEM limit; leave >=16 MiB headroom for compiler
    scratch / double buffers (v7x only has 64 MiB physical VMEM)."""
    try:
        cap = int(pltpu.get_tpu_info().vmem_capacity_bytes)
    except Exception:
        return 48 * 1024 * 1024
    return int(min(64 * 1024 * 1024,
                   max(32 * 1024 * 1024, cap - 16 * 1024 * 1024)))


def _pick_tile_rows(n, c, itemsize):
    """Largest row tile <= ~3 MiB of x, sublane aligned, preferring a tile
    that divides n (removes the ragged-tile mask from the traced kernel)."""
    sub = _sublane(itemsize)
    cap = max(sub, _TARGET_TILE_BYTES // (max(int(itemsize), 1) * max(c, 1)))
    if cap >= n:
        return n                       # single tile: full dim is always legal
    tile = max(sub, (cap // sub) * sub)
    low = max(sub, tile // 2)
    for cand in range(tile, low - 1, -sub):
        if n % cand == 0:
            return cand
    return tile


# --------------------------------------------------------------------------
# Kernels
# --------------------------------------------------------------------------
def _bn_stats_kernel(x_ref, sum_ref, sq_ref, *,
                     n_rows, tile_rows, tiles_per_core, needs_mask):
    """Accumulate per-lane sum / sum-of-squares over this core's row tiles.

    Grid is (num_partials, tiles_per_core); the leading axis is 'parallel' so
    both v7x TensorCores stream x.  Each core owns one resident (1, C) row of
    the partial-sum outputs (init at t == 0, accumulate over t)."""
    p = pl.program_id(0)
    t = pl.program_id(1)

    @pl.when(t == 0)
    def _init():
        sum_ref[...] = jnp.zeros_like(sum_ref)
        sq_ref[...] = jnp.zeros_like(sq_ref)

    x = x_ref[...].astype(jnp.float32)

    if needs_mask:
        # Logical (unclamped) tile index: rows past n_rows (ragged last tile,
        # or the phantom tile of an odd 2-core split) contribute nothing.
        g_idx = p * tiles_per_core + t
        row = lax.broadcasted_iota(jnp.int32, x.shape, 0) + g_idx * tile_rows
        x = jnp.where(row < n_rows, x, 0.0)

    if tile_rows >= 64:
        # Cross-row (sublane) reduction on the otherwise-idle MXU.
        ones = jnp.ones((8, tile_rows), jnp.float32)
        part_sum = jnp.dot(ones, x, preferred_element_type=jnp.float32)[0:1, :]
        part_sq = jnp.dot(ones, x * x,
                          preferred_element_type=jnp.float32)[0:1, :]
    else:
        part_sum = jnp.sum(x, axis=0, keepdims=True)
        part_sq = jnp.sum(x * x, axis=0, keepdims=True)

    sum_ref[...] += part_sum
    sq_ref[...] += part_sq


def _normalize_kernel(sw_ref, x_ref, mean_bn_ref, var_bn_ref, w_ref, b_ref,
                      *rest, n_features, group, eps):
    """Per-row LN stats + switch-weighted combine with BN stats + affine.

    In the lane-packed layout (group > 1) every VMEM row holds `group`
    original rows side by side; LN statistics are computed per C-wide lane
    segment with a block-diagonal ones matmul (MXU), keeping stores
    lane-dense."""
    if group > 1:
        s_ref, y_ref = rest
    else:
        (y_ref,) = rest

    c = n_features
    x = x_ref[...].astype(jnp.float32)
    inv_c = 1.0 / c
    inv_cm1 = (1.0 / (c - 1)) if c > 1 else float("nan")

    if group > 1:
        s_mat = s_ref[...]                                   # (cp, cp) block-diag
        mean_ln = jnp.dot(x, s_mat, preferred_element_type=jnp.float32) * inv_c
        xc = x - mean_ln
        var_ln = jnp.dot(xc * xc, s_mat,
                         preferred_element_type=jnp.float32) * inv_cm1
    else:
        # TODO(synk): if the XLU lane-reduce ever surfaces as the critical slot
        # on v7x bundle dumps, offload these two reduces to the MXU via a
        # (C, 128) ones-matmul like the stats kernel does.
        mean_ln = jnp.sum(x, axis=1, keepdims=True) * inv_c
        xc = x - mean_ln
        var_ln = jnp.sum(xc * xc, axis=1, keepdims=True) * inv_cm1

    mean = sw_ref[0] * mean_ln + sw_ref[1] * mean_bn_ref[...]
    var = sw_ref[2] * var_ln + sw_ref[3] * var_bn_ref[...]
    scale = lax.rsqrt(var + eps) * w_ref[...].astype(jnp.float32)  # EUP rsqrt
    y_ref[...] = ((x - mean) * scale
                  + b_ref[...].astype(jnp.float32)).astype(y_ref.dtype)


def _fused_kernel(sw_ref, x_ref, w_ref, b_ref, *rest,
                  n_rows, n_features, group, eps):
    """Single-pass SwitchNorm1d for inputs that fit in VMEM: x is read from
    HBM exactly once; BN stats (centered), LN stats and the normalization all
    happen on the resident block."""
    if group > 1:
        s_ref, m_ref, y_ref, mean_bn_ref, var_bn_ref = rest
    else:
        y_ref, mean_bn_ref, var_bn_ref = rest

    c = n_features
    x = x_ref[...].astype(jnp.float32)

    def col_sum(v):                                    # (rows, cp) -> (1, cp)
        return jnp.sum(v, axis=0, keepdims=True)

    def fold_spread(v):        # per-lane totals -> per-feature totals,
        if group == 1:         # replicated across the `group` lane segments
            return v
        v8 = jnp.broadcast_to(v, (8,) + v.shape[1:])
        return jnp.dot(v8, m_ref[...], preferred_element_type=jnp.float32)[0:1, :]

    inv_n = 1.0 / n_rows
    inv_nm1 = (1.0 / (n_rows - 1)) if n_rows > 1 else float("nan")

    # Batch-norm stats over all N original rows (centered -> better numerics).
    mean_bn = fold_spread(col_sum(x)) * inv_n
    xc_bn = x - mean_bn
    var_bn = fold_spread(col_sum(xc_bn * xc_bn)) * inv_nm1
    mean_bn_ref[...] = mean_bn
    var_bn_ref[...] = var_bn

    inv_c = 1.0 / c
    inv_cm1 = (1.0 / (c - 1)) if c > 1 else float("nan")
    if group > 1:
        s_mat = s_ref[...]
        mean_ln = jnp.dot(x, s_mat, preferred_element_type=jnp.float32) * inv_c
        xc_ln = x - mean_ln
        var_ln = jnp.dot(xc_ln * xc_ln, s_mat,
                         preferred_element_type=jnp.float32) * inv_cm1
    else:
        mean_ln = jnp.sum(x, axis=1, keepdims=True) * inv_c
        xc_ln = x - mean_ln
        var_ln = jnp.sum(xc_ln * xc_ln, axis=1, keepdims=True) * inv_cm1

    mean = sw_ref[0] * mean_ln + sw_ref[1] * mean_bn
    var = sw_ref[2] * var_ln + sw_ref[3] * var_bn
    scale = lax.rsqrt(var + eps) * w_ref[...].astype(jnp.float32)
    y_ref[...] = ((x - mean) * scale
                  + b_ref[...].astype(jnp.float32)).astype(y_ref.dtype)


# --------------------------------------------------------------------------
# Wrapper
# --------------------------------------------------------------------------
def switch_norm_1d(x, weight, bias, mean_weight, var_weight,
                   running_mean, running_var, *,
                   eps=1e-5, momentum=0.997, training=True,
                   using_moving_average=True,
                   tile_rows=None, force_two_pass=False):
    """SwitchNorm1d forward.  Returns (y, new_running_mean, new_running_var);
    in eval mode the running buffers are returned unchanged."""
    n, c = x.shape
    orig_dtype = x.dtype
    itemsize = jnp.dtype(x.dtype).itemsize

    # --- trivial scalar glue: 2-element softmaxes over the switch weights ---
    mw = jax.nn.softmax(mean_weight.astype(jnp.float32).reshape(-1))
    vw = jax.nn.softmax(var_weight.astype(jnp.float32).reshape(-1))
    sw = jnp.concatenate([mw, vw]).astype(jnp.float32)        # (4,) -> SMEM

    if weight is None:
        weight = jnp.ones((1, c), jnp.float32)
    if bias is None:
        bias = jnp.zeros((1, c), jnp.float32)
    w2 = weight.reshape(1, c)
    b2 = bias.reshape(1, c)
    rm2 = running_mean.reshape(1, c).astype(jnp.float32)
    rv2 = running_var.reshape(1, c).astype(jnp.float32)

    # --- lane-dense packing for small C: fold g = 128//C rows per VMEM row ---
    group = 1
    if c < 128 and 128 % c == 0:
        g = 128 // c
        if n % g == 0 and (n // g) >= 8:
            group = g
    cp = c * group
    n_view = n // group
    xp = x.reshape(n_view, cp)                 # contiguous reshape: free view
    w_sp = jnp.tile(w2, (1, group)) if group > 1 else w2
    b_sp = jnp.tile(b2, (1, group)) if group > 1 else b2

    s_mat = m_mat = None
    if group > 1:
        seg = jnp.arange(cp) // c              # lane -> segment (original row)
        s_mat = (seg[:, None] == seg[None, :]).astype(jnp.float32)    # (cp, cp)
        feat = jnp.arange(cp) % c              # lane -> feature
        m_mat = (feat[:, None] == feat[None, :]).astype(jnp.float32)  # (cp, cp)

    vmem_limit = _vmem_limit_bytes()
    sub = _sublane(itemsize)
    if tile_rows is None:
        tile = _pick_tile_rows(n_view, cp, itemsize)
    else:
        tile = max(1, min(int(tile_rows), n_view))
        if tile < n_view:
            tile = max(sub, (tile // sub) * sub)
    num_tiles = pl.cdiv(n_view, tile)

    def _spread(v):          # (1, c) per-feature -> (1, cp) packed lane layout
        return jnp.tile(v, (1, group)) if group > 1 else v

    def _normalize(mean_sp, var_sp):
        norm_kernel = functools.partial(
            _normalize_kernel, n_features=c, group=group, eps=float(eps))
        inputs = [sw, xp, mean_sp, var_sp, w_sp, b_sp]
        in_specs = [
            pl.BlockSpec(memory_space=pltpu.MemorySpace.SMEM),  # switch weights
            pl.BlockSpec((tile, cp), lambda t: (t, 0)),          # x tile
            pl.BlockSpec((1, cp), lambda t: (0, 0)),             # mean_bn
            pl.BlockSpec((1, cp), lambda t: (0, 0)),             # var_bn
            pl.BlockSpec((1, cp), lambda t: (0, 0)),             # weight
            pl.BlockSpec((1, cp), lambda t: (0, 0)),             # bias
        ]
        if group > 1:
            inputs.append(s_mat)
            in_specs.append(pl.BlockSpec((cp, cp), lambda t: (0, 0)))
        return pl.pallas_call(
            norm_kernel,
            out_shape=jax.ShapeDtypeStruct((n_view, cp), orig_dtype),
            grid_spec=pltpu.PrefetchScalarGridSpec(
                num_scalar_prefetch=0,
                grid=(num_tiles,),
                in_specs=in_specs,
                out_specs=pl.BlockSpec((tile, cp), lambda t: (t, 0))),
            compiler_params=pltpu.CompilerParams(
                dimension_semantics=("parallel",),
                vmem_limit_bytes=vmem_limit),
        )(*inputs)

    # ---------------------------- eval mode --------------------------------
    if not training:
        y_p = _normalize(_spread(rm2), _spread(rv2))
        return y_p.reshape(n, c), running_mean, running_var

    # --------------------------- training mode -----------------------------
    x_f32_bytes = n * c * 4
    use_fused = (not force_two_pass) and (x_f32_bytes * 8 <= vmem_limit)

    if use_fused:
        # Fused single kernel: x is read from HBM exactly once.
        fused_kernel = functools.partial(
            _fused_kernel, n_rows=n, n_features=c, group=group, eps=float(eps))
        inputs = [sw, xp, w_sp, b_sp]
        in_specs = [
            pl.BlockSpec(memory_space=pltpu.MemorySpace.SMEM),
            pl.BlockSpec((n_view, cp), lambda i: (0, 0)),
            pl.BlockSpec((1, cp), lambda i: (0, 0)),
            pl.BlockSpec((1, cp), lambda i: (0, 0)),
        ]
        if group > 1:
            inputs += [s_mat, m_mat]
            in_specs += [pl.BlockSpec((cp, cp), lambda i: (0, 0)),
                         pl.BlockSpec((cp, cp), lambda i: (0, 0))]
        y_p, mean_sp, var_sp = pl.pallas_call(
            fused_kernel,
            out_shape=(jax.ShapeDtypeStruct((n_view, cp), orig_dtype),
                       jax.ShapeDtypeStruct((1, cp), jnp.float32),
                       jax.ShapeDtypeStruct((1, cp), jnp.float32)),
            grid_spec=pltpu.PrefetchScalarGridSpec(
                num_scalar_prefetch=0,
                grid=(1,),
                in_specs=in_specs,
                out_specs=(pl.BlockSpec((n_view, cp), lambda i: (0, 0)),
                           pl.BlockSpec((1, cp), lambda i: (0, 0)),
                           pl.BlockSpec((1, cp), lambda i: (0, 0)))),
            compiler_params=pltpu.CompilerParams(
                dimension_semantics=("arbitrary",),
                vmem_limit_bytes=vmem_limit),
        )(*inputs)
        mean_bn = mean_sp[:, :c]
        var_bn = var_sp[:, :c]
    else:
        # Pass 1: per-lane sums over row tiles; leading grid axis is parallel
        # so both v7x TensorCores stream x (harmless serial loop on 1-TC chips).
        num_par = 2 if num_tiles >= 2 else 1
        tpc = pl.cdiv(num_tiles, num_par)
        needs_mask = (n_view % tile != 0) or (num_par * tpc != num_tiles)
        if num_par * tpc == num_tiles:
            x1_map = lambda p, t: (p * tpc + t, 0)
        else:
            # Phantom tile of an odd split: clamp the DMA to the last valid
            # block; the in-kernel row mask zeroes its contribution.
            x1_map = lambda p, t: (jnp.minimum(p * tpc + t, num_tiles - 1), 0)

        stats_kernel = functools.partial(
            _bn_stats_kernel, n_rows=n_view, tile_rows=tile,
            tiles_per_core=tpc, needs_mask=needs_mask)
        part_sum, part_sq = pl.pallas_call(
            stats_kernel,
            out_shape=(jax.ShapeDtypeStruct((num_par, cp), jnp.float32),
                       jax.ShapeDtypeStruct((num_par, cp), jnp.float32)),
            grid_spec=pltpu.PrefetchScalarGridSpec(
                num_scalar_prefetch=0,
                grid=(num_par, tpc),
                in_specs=[pl.BlockSpec((tile, cp), x1_map)],
                out_specs=(pl.BlockSpec((1, cp), lambda p, t: (p, 0)),
                           pl.BlockSpec((1, cp), lambda p, t: (p, 0)))),
            compiler_params=pltpu.CompilerParams(
                dimension_semantics=("parallel", "arbitrary"),
                vmem_limit_bytes=vmem_limit),
        )(xp)

        # Tiny O(C) finalize in plain JAX: fold lanes -> features, unbiased
        # BN stats from sum / sum-sq (ddof=1, matching torch.var default).
        lane_sum = jnp.sum(part_sum, axis=0, keepdims=True)        # (1, cp)
        lane_sq = jnp.sum(part_sq, axis=0, keepdims=True)
        if group > 1:
            feat_sum = lane_sum.reshape(group, c).sum(axis=0, keepdims=True)
            feat_sq = lane_sq.reshape(group, c).sum(axis=0, keepdims=True)
        else:
            feat_sum, feat_sq = lane_sum, lane_sq
        mean_bn = feat_sum * (1.0 / n)
        denom = (n - 1) if n > 1 else 1
        var_bn = (feat_sq - n * mean_bn * mean_bn) * (1.0 / denom)

        # Pass 2: normalize (megacore-parallel over row tiles).
        y_p = _normalize(_spread(mean_bn), _spread(var_bn))

    # --- running-buffer update (returned in the caller's shape / dtype) -----
    if using_moving_average:
        new_rm = momentum * rm2 + (1.0 - momentum) * mean_bn
        new_rv = momentum * rv2 + (1.0 - momentum) * var_bn
    else:
        new_rm = rm2 + mean_bn
        new_rv = rv2 + mean_bn * mean_bn + var_bn
    new_rm = new_rm.reshape(running_mean.shape).astype(running_mean.dtype)
    new_rv = new_rv.reshape(running_var.shape).astype(running_var.dtype)
    return y_p.reshape(n, c), new_rm, new_rv


# --------------------------------------------------------------------------
# Pure-JAX reference + tests
# --------------------------------------------------------------------------
def _reference(x, weight, bias, mean_weight, var_weight,
               running_mean, running_var, eps=1e-5, momentum=0.997,
               training=True):
    x = x.astype(jnp.float32)
    mean_ln = jnp.mean(x, axis=1, keepdims=True)
    var_ln = jnp.var(x, axis=1, keepdims=True, ddof=1)
    if training:
        mean_bn = jnp.mean(x, axis=0, keepdims=True)
        var_bn = jnp.var(x, axis=0, keepdims=True, ddof=1)
        new_rm = momentum * running_mean + (1 - momentum) * mean_bn
        new_rv = momentum * running_var + (1 - momentum) * var_bn
    else:
        mean_bn, var_bn = running_mean, running_var
        new_rm, new_rv = running_mean, running_var
    mw = jax.nn.softmax(mean_weight)
    vw = jax.nn.softmax(var_weight)
    mean = mw[0] * mean_ln + mw[1] * mean_bn
    var = vw[0] * var_ln + vw[1] * var_bn
    y = (x - mean) / jnp.sqrt(var + eps)
    return y * weight + bias, new_rm, new_rv


def _run_case(seed, n, c, *, tile_rows=None, force_two_pass=False,
              training=True, label=""):
    key = jax.random.PRNGKey(seed)
    kx, kw, kb, km, kv = jax.random.split(key, 5)
    x = jax.random.normal(kx, (n, c), dtype=jnp.float32)
    weight = 1.0 + 0.1 * jax.random.normal(kw, (1, c), dtype=jnp.float32)
    bias = 0.1 * jax.random.normal(kb, (1, c), dtype=jnp.float32)
    mean_weight = jnp.array([1.0, 0.5], dtype=jnp.float32)
    var_weight = jnp.array([0.2, 1.0], dtype=jnp.float32)
    running_mean = 0.1 * jax.random.normal(km, (1, c), dtype=jnp.float32)
    running_var = 0.5 + jnp.abs(jax.random.normal(kv, (1, c), dtype=jnp.float32))

    y_ref, rm_ref, rv_ref = _reference(
        x, weight, bias, mean_weight, var_weight, running_mean, running_var,
        training=training)

    y, new_rm, new_rv = switch_norm_1d(
        x, weight, bias, mean_weight, var_weight, running_mean, running_var,
        training=training, tile_rows=tile_rows, force_two_pass=force_two_pass)
    jax.block_until_ready((y, new_rm, new_rv))

    assert jnp.allclose(y, y_ref, atol=2e-5, rtol=2e-5), f"y mismatch: {label}"
    assert jnp.allclose(new_rm, rm_ref, atol=1e-5, rtol=1e-5), \
        f"running_mean mismatch: {label}"
    assert jnp.allclose(new_rv, rv_ref, atol=1e-5, rtol=1e-5), \
        f"running_var mismatch: {label}"


if __name__ == "__main__":
    # Module-consistent small shape: fused path, unpacked (too few rows to pack).
    _run_case(0, 8, 32, label="fused-small-c32")
    # Fused + lane-packed (g=4 -> 128 lanes), MXU segment matmuls.
    _run_case(1, 64, 32, label="fused-packed")
    # Two-pass, lane-packed, ragged last tile (mask path), dual-partial stats.
    _run_case(2, 48, 32, tile_rows=8, force_two_pass=True,
              label="two-pass-packed-ragged")
    # Two-pass, lane-packed, odd tile count (clamped phantom tile).
    _run_case(3, 96, 32, tile_rows=8, force_two_pass=True,
              label="two-pass-clamp")
    # Two-pass, lane-dense C=256, MXU ones-reduction branch, parallel pass 2.
    _run_case(4, 256, 256, tile_rows=64, force_two_pass=True,
              label="two-pass-c256")
    # Small C that does not divide 128: unpacked fallback (masked stores).
    _run_case(5, 40, 48, label="fused-c48")
    # Eval mode: normalize-only path using the running buffers.
    _run_case(6, 32, 32, training=False, label="eval-packed")

    print("KERNEL_OK")
</pallas_src>

<mosaic_0001>
module attributes {stable_mosaic.version = 11 : i64} {
  func.func @_fused_kernel(%arg0: i32, %arg1: memref<4xf32, #tpu.memory_space<smem>>, %arg2: memref<8x32xf32, #tpu.memory_space<vmem>>, %arg3: memref<1x32xf32, #tpu.memory_space<vmem>>, %arg4: memref<1x32xf32, #tpu.memory_space<vmem>>, %arg5: memref<8x32xf32, #tpu.memory_space<vmem>>, %arg6: memref<1x32xf32, #tpu.memory_space<vmem>>, %arg7: memref<1x32xf32, #tpu.memory_space<vmem>>) attributes {dimension_semantics = [#tpu.dimension_semantics<arbitrary>], iteration_bounds = array<i64: 1>, scalar_prefetch = 0 : i64, scratch_operands = 0 : i64, tpu.core_type = #tpu.core_type<tc>, window_params = [{transform_indices = @transform_0, window_bounds = array<i64: 4>}, {pipeline_mode = #tpu.pipeline_mode<synchronous>, transform_indices = @transform_1, window_bounds = array<i64: 8, 32>}, {pipeline_mode = #tpu.pipeline_mode<synchronous>, transform_indices = @transform_2, window_bounds = array<i64: 1, 32>}, {pipeline_mode = #tpu.pipeline_mode<synchronous>, transform_indices = @transform_3, window_bounds = array<i64: 1, 32>}, {pipeline_mode = #tpu.pipeline_mode<synchronous>, transform_indices = @transform_4, window_bounds = array<i64: 8, 32>}, {pipeline_mode = #tpu.pipeline_mode<synchronous>, transform_indices = @transform_5, window_bounds = array<i64: 1, 32>}, {pipeline_mode = #tpu.pipeline_mode<synchronous>, transform_indices = @transform_6, window_bounds = array<i64: 1, 32>}]} {
    %c0 = arith.constant 0 : index
    %c0_0 = arith.constant 0 : index
    %0 = vector.load %arg2[%c0, %c0_0] : memref<8x32xf32, #tpu.memory_space<vmem>>, vector<8x32xf32>
    %cst = arith.constant dense<0.000000e+00> : vector<32xf32>
    %1 = vector.multi_reduction <add>, %0, %cst [0] : vector<8x32xf32> to vector<32xf32>
    %2 = vector.shape_cast %1 : vector<32xf32> to vector<1x32xf32>
    %cst_1 = arith.constant 1.250000e-01 : f32
    %3 = vector.broadcast %cst_1 : f32 to vector<1x32xf32>
    %4 = arith.mulf %2, %3 : vector<1x32xf32>
    %5 = vector.broadcast %4 : vector<1x32xf32> to vector<8x32xf32>
    %6 = arith.subf %0, %5 : vector<8x32xf32>
    %7 = arith.mulf %6, %6 : vector<8x32xf32>
    %cst_2 = arith.constant dense<0.000000e+00> : vector<32xf32>
    %8 = vector.multi_reduction <add>, %7, %cst_2 [0] : vector<8x32xf32> to vector<32xf32>
    %9 = vector.shape_cast %8 : vector<32xf32> to vector<1x32xf32>
    %cst_3 = arith.constant 0.142857149 : f32
    %10 = vector.broadcast %cst_3 : f32 to vector<1x32xf32>
    %11 = arith.mulf %9, %10 : vector<1x32xf32>
    %c0_4 = arith.constant 0 : index
    %c0_5 = arith.constant 0 : index
    %12 = vector.load %arg6[%c0_4, %c0_5] : memref<1x32xf32, #tpu.memory_space<vmem>>, vector<1x32xf32>
    tpu.vector_store %arg6[%c0_4, %c0_5], %4 {strides = array<i32>} : memref<1x32xf32, #tpu.memory_space<vmem>>, vector<1x32xf32>,
    %c0_6 = arith.constant 0 : index
    %c0_7 = arith.constant 0 : index
    %13 = vector.load %arg7[%c0_6, %c0_7] : memref<1x32xf32, #tpu.memory_space<vmem>>, vector<1x32xf32>
    tpu.vector_store %arg7[%c0_6, %c0_7], %11 {strides = array<i32>} : memref<1x32xf32, #tpu.memory_space<vmem>>, vector<1x32xf32>,
    %cst_8 = arith.constant dense<0.000000e+00> : vector<8xf32>
    %14 = vector.multi_reduction <add>, %0, %cst_8 [1] : vector<8x32xf32> to vector<8xf32>
    %15 = vector.shape_cast %14 : vector<8xf32> to vector<8x1xf32>
    %cst_9 = arith.constant 3.125000e-02 : f32
    %16 = vector.broadcast %cst_9 : f32 to vector<8x1xf32>
    %17 = arith.mulf %15, %16 : vector<8x1xf32>
    %18 = vector.broadcast %17 : vector<8x1xf32> to vector<8x32xf32>
    %19 = arith.subf %0, %18 : vector<8x32xf32>
    %20 = arith.mulf %19, %19 : vector<8x32xf32>
    %cst_10 = arith.constant dense<0.000000e+00> : vector<8xf32>
    %21 = vector.multi_reduction <add>, %20, %cst_10 [1] : vector<8x32xf32> to vector<8xf32>
    %22 = vector.shape_cast %21 : vector<8xf32> to vector<8x1xf32>
    %cst_11 = arith.constant 0.0322580636 : f32
    %23 = vector.broadcast %cst_11 : f32 to vector<8x1xf32>
    %24 = arith.mulf %22, %23 : vector<8x1xf32>
    %c0_12 = arith.constant 0 : index
    %25 = memref.load %arg1[%c0_12] : memref<4xf32, #tpu.memory_space<smem>>
    %26 = vector.broadcast %25 : f32 to vector<8x1xf32>
    %27 = arith.mulf %26, %17 : vector<8x1xf32>
    %c1 = arith.constant 1 : index
    %28 = memref.load %arg1[%c1] : memref<4xf32, #tpu.memory_space<smem>>
    %29 = vector.broadcast %28 : f32 to vector<1x32xf32>
    %30 = arith.mulf %29, %4 : vector<1x32xf32>
    %31 = vector.broadcast %27 : vector<8x1xf32> to vector<8x32xf32>
    %32 = vector.broadcast %30 : vector<1x32xf32> to vector<8x32xf32>
    %33 = arith.addf %31, %32 : vector<8x32xf32>
    %c2 = arith.constant 2 : index
    %34 = memref.load %arg1[%c2] : memref<4xf32, #tpu.memory_space<smem>>
    %35 = vector.broadcast %34 : f32 to vector<8x1xf32>
    %36 = arith.mulf %35, %24 : vector<8x1xf32>
    %c3 = arith.constant 3 : index
    %37 = memref.load %arg1[%c3] : memref<4xf32, #tpu.memory_space<smem>>
    %38 = vector.broadcast %37 : f32 to vector<1x32xf32>
    %39 = arith.mulf %38, %11 : vector<1x32xf32>
    %40 = vector.broadcast %36 : vector<8x1xf32> to vector<8x32xf32>
    %41 = vector.broadcast %39 : vector<1x32xf32> to vector<8x32xf32>
    %42 = arith.addf %40, %41 : vector<8x32xf32>
    %cst_13 = arith.constant 9.99999974E-6 : f32
    %43 = vector.broadcast %cst_13 : f32 to vector<8x32xf32>
    %44 = arith.addf %42, %43 : vector<8x32xf32>
    %45 = math.rsqrt %44 : vector<8x32xf32>
    %c0_14 = arith.constant 0 : index
    %c0_15 = arith.constant 0 : index
    %46 = vector.load %arg3[%c0_14, %c0_15] : memref<1x32xf32, #tpu.memory_space<vmem>>, vector<1x32xf32>
    %47 = vector.broadcast %46 : vector<1x32xf32> to vector<8x32xf32>
    %48 = arith.mulf %45, %47 : vector<8x32xf32>
    %49 = arith.subf %0, %33 : vector<8x32xf32>
    %50 = arith.mulf %49, %48 : vector<8x32xf32>
    %c0_16 = arith.constant 0 : index
    %c0_17 = arith.constant 0 : index
    %51 = vector.load %arg4[%c0_16, %c0_17] : memref<1x32xf32, #tpu.memory_space<vmem>>, vector<1x32xf32>
    %52 = vector.broadcast %51 : vector<1x32xf32> to vector<8x32xf32>
    %53 = arith.addf %50, %52 : vector<8x32xf32>
    %c0_18 = arith.constant 0 : index
    %c0_19 = arith.constant 0 : index
    %54 = vector.load %arg5[%c0_18, %c0_19] : memref<8x32xf32, #tpu.memory_space<vmem>>, vector<8x32xf32>
    tpu.vector_store %arg5[%c0_18, %c0_19], %53 {strides = array<i32>} : memref<8x32xf32, #tpu.memory_space<vmem>>, vector<8x32xf32>,
    return
  }
  func.func @transform_0(%arg0: i32) -> i32 {
    %c0_i32 = arith.constant 0 : i32
    %c0_i32_0 = arith.constant 0 : i32
    return %c0_i32 : i32
  }
  func.func @transform_1(%arg0: i32) -> (i32, i32) {
    %c0_i32 = arith.constant 0 : i32
    %c0_i32_0 = arith.constant 0 : i32
    %c0_i32_1 = arith.constant 0 : i32
    return %c0_i32, %c0_i32_0 : i32, i32
  }
  func.func @transform_2(%arg0: i32) -> (i32, i32) {
    %c0_i32 = arith.constant 0 : i32
    %c0_i32_0 = arith.constant 0 : i32
    %c0_i32_1 = arith.constant 0 : i32
    return %c0_i32, %c0_i32_0 : i32, i32
  }
  func.func @transform_3(%arg0: i32) -> (i32, i32) {
    %c0_i32 = arith.constant 0 : i32
    %c0_i32_0 = arith.constant 0 : i32
    %c0_i32_1 = arith.constant 0 : i32
    return %c0_i32, %c0_i32_0 : i32, i32
  }
  func.func @transform_4(%arg0: i32) -> (i32, i32) {
    %c0_i32 = arith.constant 0 : i32
    %c0_i32_0 = arith.constant 0 : i32
    %c0_i32_1 = arith.constant 0 : i32
    return %c0_i32, %c0_i32_0 : i32, i32
  }
  func.func @transform_5(%arg0: i32) -> (i32, i32) {
    %c0_i32 = arith.constant 0 : i32
    %c0_i32_0 = arith.constant 0 : i32
    %c0_i32_1 = arith.constant 0 : i32
    return %c0_i32, %c0_i32_0 : i32, i32
  }
  func.func @transform_6(%arg0: i32) -> (i32, i32) {
    %c0_i32 = arith.constant 0 : i32
    %c0_i32_0 = arith.constant 0 : i32
    %c0_i32_1 = arith.constant 0 : i32
    return %c0_i32, %c0_i32_0 : i32, i32
  }
}

</mosaic_0001>

<bundles_post_ra>
// kernel: tpu_custom_call.1
= control target key start
LH: loop header
LB: loop body
LE: loop exit
PB: predicated region body
PF: predicated region fallthrough
CT: control target
= control target key end

     0   :  { %12 = vsyncpa [#allocation5], 0  ;;  %s398_s0 = inlined_call_operand.hbm [shape: f32[4], index: 0, kind: input, shape index: {}]   ;;  %s399_s1 = inlined_call_operand.hbm [shape: f32[8,32], index: 1, kind: input, shape index: {}]   ;;  %s400_s2 = inlined_call_operand.vmem [shape: f32[1,32], index: 2, kind: input, shape index: {}]   ;;  %s401_s3 = inlined_call_operand.vmem [shape: f32[1,32], index: 3, kind: input, shape index: {}]   ;;  %s402_s4 = inlined_call_operand.hbm [shape: f32[8,32], index: 4, kind: output, shape index: {0}]   ;;  %s403_s5 = inlined_call_operand.hbm [shape: f32[1,32], index: 5, kind: output, shape index: {1}]   ;;  %s404_s6 = inlined_call_operand.hbm [shape: f32[1,32], index: 6, kind: output, shape index: {2}]  }
   0x1   :  { %13 = vsyncpa [#allocation3], 0 }
   0x2   :  { %14 = vsyncpa [#allocation4], 0 }
   0x3   :  { %15 = vsyncpa [#allocation9], 0  ;;  %s167_s23 = scalar_lea.hbm %s398_s0, 16 }
   0x4   :  { %p168_p0 = scmp.ne.s32.totalorder %s398_s0, %s167_s23  ;;  %p171_p1 = scmp.lt.u32.totalorder %s167_s23, %s398_s0 }
   0x6   :  { %p173_p2 = pnand %p171_p1, %p168_p0 }
   0x8   :  { %176 = shalt.err (!%p173_p2)
}
   0x9   :  { %s273_s28 = smov [#allocation2]   ;;  %s274_s7 = smov [#allocation6]  }
   0xa   :  { %23 = dma.hbm_to_smem %s398_s0, 16, %s273_s28, [#allocation5]  }
   0xb   :  { %s30_s8 = sshll.u32 %s274_s7, 4  ;;  %s177_s11 = scalar_lea.hbm %s399_s1, 128  ;;  %s31_s8 = int_to_ptr.vmem [resolvable:$true] %s30_s8 }
   0xc   :  { %p178_p3 = scmp.ne.s32.totalorder %s399_s1, %s177_s11  ;;  %p181_p4 = scmp.lt.u32.totalorder %s177_s11, %s399_s1 }
   0xe   :  { %p183_p5 = pnand %p181_p4, %p178_p3 }
  0x10   :  { %186 = shalt.err (!%p183_p5)
}
  0x11   :  { %s187_s16 = scalar_lea.vmem %s31_s8, 128  ;;  %p192_p7 = scmp.lt.s32.totalorder %s31_s8, %s31_s8 }
  0x12   :  { %p188_p6 = scmp.ne.s32.totalorder %s31_s8, %s187_s16  ;;  %p193_p8 = scmp.lt.s32.totalorder %s187_s16, %s187_s16 }
  0x14   :  { %p194_p9 = por %p193_p8, %p192_p7 }
  0x16   :  { %p195_p10 = pnand %p194_p9, %p188_p6 }
  0x18   :  { %198 = shalt.err (!%p195_p10)
}
  0x19   :  { %33 = dma.hbm_to_vmem [thread:$0]  %s399_s1, 128, %s31_s8, [#allocation3]  }
  0x1a   :  { %265 = dma.done.wait [#allocation5], 16  }
  0x1b   :  { %266 = vsyncadd [#allocation5], 4294967280 }
  0x1c   :  { %267 = dma.done.wait [#allocation3], 128  }
  0x1d   :  { %268 = vsyncadd [#allocation3], 4294967168 }
  0x1e   :  { %44 = sfence }
  0x1f   :  { %v337_v0 = vld [vmem:[#allocation6] sm:$0xff]  ;;  %vm46_vm0 = vcmask 261120   ;;  %vm65_vm1 = vcmask 253952   ;;  %s275_s1 = smov [#allocation8]  }
  0x20   :  { %v47_v1 = vsel %vm46_vm0, %v337_v0, 0.0  ;;  %s128_s18 = sshll.u32 %s275_s1, 4  ;;  %s129_s18 = int_to_ptr.vmem [resolvable:$true] %s128_s18 }
  0x21   :  { %68 = vadd.xlane.f32.xlu0 %v47_v1  ;;  %v48_v2 = vrot.slane %v47_v1, 4  ;;  %s199_s19 = scalar_lea.vmem %s129_s18, 16  ;;  %s203_s20 = scalar_lea.vmem %s129_s18, 32 }
  0x22   :  { %p200_p11 = scmp.ne.s32.totalorder %s129_s18, %s199_s19  ;;  %p204_p12 = scmp.lt.s32.totalorder %s129_s18, %s129_s18 }
  0x23   :  { %v49_v3 = vadd.f32 %v48_v2, %v47_v1  ;;  %p205_p13 = scmp.lt.s32.totalorder %s203_s20, %s199_s19 }
  0x25   :  { %v50_v4 = vrot.slane %v49_v3, 2  ;;  %p206_p0 = por %p205_p13, %p204_p12 }
  0x27   :  { %v51_v5 = vadd.f32 %v50_v4, %v49_v3  ;;  %p207_p1 = pnand %p206_p0, %p200_p11 }
  0x29   :  { %v52_v6 = vrot.slane %v51_v5, 1 }
  0x2b   :  { %v53_v7 = vadd.f32 %v52_v6, %v51_v5 }
  0x2d   :  { %v341_v8 = vmul.f32 0.125, %v53_v7 }
  0x2f   :  { %v55_v9 = vsub.f32 %v337_v0, %v341_v8  ;;  %66 = vst.msk [vmem:[#allocation8] sm:$0x1] %vm65_vm1, %v341_v8 }
  0x31   :  { %v56_v10 = vmul.f32 %v55_v9, %v55_v9 }
  0x33   :  { %v57_v13 = vsel %vm46_vm0, %v56_v10, 0.0 }
  0x34   :  { %v58_v16 = vrot.slane %v57_v13, 4 }
  0x36   :  { %v59_v18 = vadd.f32 %v58_v16, %v57_v13 }
  0x38   :  { %v60_v19 = vrot.slane %v59_v18, 2 }
  0x3a   :  { %v61_v20 = vadd.f32 %v60_v19, %v59_v18 }
  0x3c   :  { %v62_v21 = vrot.slane %v61_v20, 1 }
  0x3e   :  { %v63_v22 = vadd.f32 %v62_v21, %v61_v20 }
  0x40   :  { %v64_v23 = vmul.f32 0.14285715, %v63_v22 }
  0x42   :  { %67 = vst.msk [vmem:[#allocation10] sm:$0x1] %vm65_vm1, %v64_v23 }
  0xae   :  { %v69_v11 = vpop.xlane.xlu0 %68 }
  0xaf   :  { %v345_v12 = vmul.f32 0.03125, %v69_v11 }
  0xb1   :  { %v71_v14 = vsub.f32 %v337_v0, %v345_v12 }
  0xb3   :  { %v72_v15 = vmul.f32 %v71_v14, %v71_v14 }
  0xb5   :  { %v73_v17 = vsel %vm46_vm0, %v72_v15, 0.0 }
  0xb6   :  { %74 = vadd.xlane.f32.xlu0 %v73_v17 }
  0xb7   :  { %210 = shalt.err (!%p207_p1)
}
  0xb8   :  { %s211_s23 = scalar_lea.hbm %s403_s5, 16 }
  0xb9   :  { %p212_p2 = scmp.ne.s32.totalorder %s403_s5, %s211_s23  ;;  %p215_p3 = scmp.lt.u32.totalorder %s211_s23, %s403_s5 }
  0xbb   :  { %p217_p4 = pnand %p215_p3, %p212_p2 }
  0xbd   :  { %220 = shalt.err (!%p217_p4)
}
  0xbe   :  { %131 = dma.vmem_to_hbm [thread:$0]  %s129_s18, 16, %s403_s5, [#allocation9]  }
  0xbf   :  { %s276_s30 = smov [#allocation10]  }
  0xc0   :  { %s138_s7 = sshll.u32 %s276_s30, 4  ;;  %s139_s7 = int_to_ptr.vmem [resolvable:$true] %s138_s7 }
  0xc1   :  { %s221_s8 = scalar_lea.vmem %s139_s7, 16  ;;  %s225_s9 = scalar_lea.vmem %s139_s7, 32 }
  0xc2   :  { %p222_p5 = scmp.ne.s32.totalorder %s139_s7, %s221_s8  ;;  %p226_p6 = scmp.lt.s32.totalorder %s139_s7, %s139_s7 }
  0xc3   :  { %p227_p7 = scmp.lt.s32.totalorder %s225_s9, %s221_s8 }
  0xc5   :  { %p228_p8 = por %p227_p7, %p226_p6 }
  0xc7   :  { %p229_p9 = pnand %p228_p8, %p222_p5 }
  0xc9   :  { %232 = shalt.err (!%p229_p9)
}
  0xca   :  { %s233_s12 = scalar_lea.hbm %s404_s6, 16 }
  0xcb   :  { %p234_p10 = scmp.ne.s32.totalorder %s404_s6, %s233_s12  ;;  %p237_p11 = scmp.lt.u32.totalorder %s233_s12, %s404_s6 }
  0xcd   :  { %p239_p12 = pnand %p237_p11, %p234_p10 }
  0xcf   :  { %242 = shalt.err (!%p239_p12)
}
  0xd0   :  { %141 = dma.vmem_to_hbm [thread:$0]  %s139_s7, 16, %s404_s6, [#allocation9]   ;;  %v158_v37 = vld [vmem:[%s400_s2] ss:$0 sm:$0xff] }
  0xd1   :  { %s157_s17 = sld [smem:[#allocation2 + $0x3]]  ;;  %s156_s1 = sld [smem:[#allocation2 + $0x2]]  ;;  %v159_v41 = vld [vmem:[%s401_s3] ss:$0 sm:$0xff] }
  0xd2   :  { %s77_s18 = sld [smem:[#allocation2]]  ;;  %s155_s19 = sld [smem:[#allocation2 + $0x1]] }
  0xd3   :  { %s277_s23 = smov [#allocation7]  }
  0xd4   :  { %s118_s24 = sshll.u32 %s277_s23, 4  ;;  %s119_s24 = int_to_ptr.vmem [resolvable:$true] %s118_s24 }
  0xd5   :  { %s243_s25 = scalar_lea.vmem %s119_s24, 128  ;;  %p248_p0 = scmp.lt.s32.totalorder %s119_s24, %s119_s24 }
  0xd6   :  { %p244_p13 = scmp.ne.s32.totalorder %s119_s24, %s243_s25  ;;  %p249_p1 = scmp.lt.s32.totalorder %s243_s25, %s243_s25 }
  0xd7   :  { %v88_v24 = vstv %s157_s17  ;;  %v85_v25 = vstv %s156_s1 }
  0xd8   :  { %v89_v28 = vmul.f32 %v88_v24, %v64_v23  ;;  %v78_v32 = vstv %s77_s18  ;;  %v81_v33 = vstv %s155_s19  ;;  %p250_p2 = por %p249_p1, %p248_p0 }
  0xd9   :  { %v79_v34 = vmul.f32 %v78_v32, %v345_v12  ;;  %v82_v35 = vmul.f32 %v81_v33, %v341_v8 }
  0xda   :  { %p251_p3 = pnand %p250_p2, %p244_p13 }
  0xdb   :  { %v83_v36 = vadd.f32 %v82_v35, %v79_v34 }
  0xdd   :  { %v101_v40 = vsub.f32 %v337_v0, %v83_v36 }
 0x143   :  { %v75_v26 = vpop.xlane.xlu0 %74 }
 0x144   :  { %v76_v27 = vmul.f32 0.032258064, %v75_v26 }
 0x146   :  { %v86_v29 = vmul.f32 %v85_v25, %v76_v27 }
 0x148   :  { %v90_v30 = vadd.f32 %v89_v28, %v86_v29 }
 0x14a   :  { %v91_v31 = vadd.f32 1e-05, %v90_v30 }
 0x14c   :  { %165 = vrsqrt.f32 %v91_v31 }
 0x156   :  { %v166_v38 = vpop.eup %165 }
 0x157   :  { %v100_v39 = vmul.f32 %v166_v38, %v158_v37 }
 0x159   :  { %v102_v42 = vmul.f32 %v101_v40, %v100_v39 }
 0x15b   :  { %v110_v43 = vadd.f32 %v159_v41, %v102_v42 }
 0x15d   :  { %111 = vst.msk [vmem:[#allocation7] sm:$0xff] %vm46_vm0, %v110_v43 }
 0x15e   :  { %254 = shalt.err (!%p251_p3)
}
 0x15f   :  { %s255_s27 = scalar_lea.hbm %s402_s4, 128 }
 0x160   :  { %p256_p4 = scmp.ne.s32.totalorder %s402_s4, %s255_s27  ;;  %p259_p5 = scmp.lt.u32.totalorder %s255_s27, %s402_s4 }
 0x162   :  { %p261_p6 = pnand %p259_p5, %p256_p4 }
 0x164   :  { %264 = shalt.err (!%p261_p6)
}
 0x165   :  { %121 = dma.vmem_to_hbm [thread:$0]  %s119_s24, 128, %s402_s4, [#allocation4]  }
 0x166   :  { %269 = dma.done.wait [#allocation4], 128  }
 0x167   :  { %270 = vsyncadd [#allocation4], 4294967168 }
 0x168   :  { %271 = dma.done.wait [#allocation9], 32  }
 0x169   :  { %272 = vsyncadd [#allocation9], 4294967264 }
 0x16a   :  { %151 = vsyncpa [#allocation3], 1 }
 0x16b   :  { %152 = vsyncpa [#allocation4], 1 }
 0x16c   :  { %153 = vsyncpa [#allocation9], 1 }
 0x16d   :  { %154 = vsyncpa [#allocation5], 1 }

</bundles_post_ra>
